<compile_context>
chip_gen: v7x
topology: tpu7x:2x2x1
jax: 0.10.0
libtpu: 0.0.40
codegen_flags: <defaults>
</compile_context>

<pallas_src>
import jax
import jax.numpy as jnp
from jax.experimental import pallas as pl
from jax.experimental.pallas import tpu as pltpu


# ---------------------------- model dimensions -----------------------------

VOCAB = 100
SEG_TYPES = 2
HIDDEN = 32
NUM_HEADS = 2
HEAD_DIM = HIDDEN // NUM_HEADS
FFN_DIM = 64
MAX_SEQ = 16
NUM_CLASSES = 16
CLS_PAD = 128              # classifier N padded to a full lane group -> unmasked stores
LN_EPS = 1e-12
BATCH_BLOCK = 8            # max examples stacked per grid step

# bf16 weight slab (all weights with K = HIDDEN), static column offsets
C_QKV = 0                              # (H, 3H)  Q columns pre-scaled by 1/sqrt(DH)
C_O = C_QKV + 3 * HIDDEN               # (H, H)
C_FF1 = C_O + HIDDEN                   # (H, FFN)
C_POOL = C_FF1 + FFN_DIM               # (H, H)
C_CLS = C_POOL + HIDDEN                # (H, CLS_PAD)
W32_COLS = 384                         # 352 used, padded to a multiple of 128 lanes

# f32 bias/gamma/beta table rows (each row padded to 128 lanes)
R_LN_EMB_G, R_LN_EMB_B = 0, 1
R_B_QKV = 2
R_B_O = 3
R_LN1_G, R_LN1_B = 4, 5
R_B_FF1 = 6
R_B_FF2 = 7
R_LN2_G, R_LN2_B = 8, 9
R_B_POOL = 10
R_B_CLS = 11
VEC_ROWS_PAD = 16
VEC_COLS = 128


# ------------------------------ fused kernel -------------------------------


def _fused_bert_kernel(emb_ref, bias_ref, w32_ref, wff2_ref, vec_ref, out_ref):
    """One block of stacked batch rows (Bt*S, H) per grid step; all intermediates in VMEM/vregs."""

    def vrow(r, n=HIDDEN):
        return vec_ref[r:r + 1, :n]                                   # (1, n) f32, static slice

    def ln(x, g_row, b_row):
        # one-pass statistics: E[x], E[x^2]
        mean = jnp.mean(x, axis=-1, keepdims=True)
        meansq = jnp.mean(x * x, axis=-1, keepdims=True)
        var = jnp.maximum(meansq - mean * mean, 0.0)
        return (x - mean) * jax.lax.rsqrt(var + LN_EPS) * vrow(g_row) + vrow(b_row)

    def mm32(x, col, n, b_row):
        # bf16 MXU operands, f32 accumulation; bias add in f32.
        w = w32_ref[:, col:col + n]                                   # bf16 (H, n), static slice
        return jnp.dot(x.astype(jnp.bfloat16), w,
                       preferred_element_type=jnp.float32) + vrow(b_row, n)

    x0 = ln(emb_ref[...], R_LN_EMB_G, R_LN_EMB_B)                     # (R, H) f32
    bias = bias_ref[0]                                                # (R, R) block-diag -1e9 mask

    # ---- multi-head self-attention (block-diagonal over stacked examples) ----
    qkv = mm32(x0, C_QKV, 3 * HIDDEN, R_B_QKV)                        # (R, 3H); Q pre-scaled
    attn = jnp.zeros((x0.shape[0], HIDDEN), jnp.float32)
    for h in range(NUM_HEADS):
        lo = h * HEAD_DIM
        q = qkv[:, lo:lo + HEAD_DIM]
        k = qkv[:, HIDDEN + lo:HIDDEN + lo + HEAD_DIM]
        v = qkv[:, 2 * HIDDEN + lo:2 * HIDDEN + lo + HEAD_DIM]
        s = jax.lax.dot_general(q.astype(jnp.bfloat16), k.astype(jnp.bfloat16),
                                (((1,), (1,)), ((), ())),
                                preferred_element_type=jnp.float32) + bias     # (R, R)
        m = jnp.max(s, axis=-1, keepdims=True)
        p = jnp.exp(s - m)
        p = p * pl.reciprocal(jnp.sum(p, axis=-1, keepdims=True), approx=True)
        ctx = jnp.dot(p.astype(jnp.bfloat16), v.astype(jnp.bfloat16),
                      preferred_element_type=jnp.float32)                      # (R, DH)
        # per-head slice of w_o accumulated in f32 (no cross-lane head concat)
        attn = attn + jnp.dot(ctx.astype(jnp.bfloat16),
                              w32_ref[lo:lo + HEAD_DIM, C_O:C_O + HIDDEN],
                              preferred_element_type=jnp.float32)
    x1 = ln(x0 + attn + vrow(R_B_O), R_LN1_G, R_LN1_B)

    # ---- feed-forward + residual + layernorm ----
    # TODO(synk): PyTorch nn.GELU defaults to the exact erf form; tanh approximation used here.
    h_mid = jax.nn.gelu(mm32(x1, C_FF1, FFN_DIM, R_B_FF1), approximate=True)
    ff2 = jnp.dot(h_mid.astype(jnp.bfloat16), wff2_ref[...],
                  preferred_element_type=jnp.float32) + vrow(R_B_FF2)
    x2 = ln(x1 + ff2, R_LN2_G, R_LN2_B)

    # ---- BERT pooler (tanh) -> dropout -> classifier ----
    # Applied to all rows (wasted FLOPs are free in this regime); [CLS] rows selected in JAX.
    # TODO(synk): nn.Dropout applied as identity (eval/inference mode); no RNG drop mask.
    pooled = jnp.tanh(mm32(x2, C_POOL, HIDDEN, R_B_POOL))             # (R, H)
    out_ref[...] = mm32(pooled, C_CLS, CLS_PAD, R_B_CLS)              # (R, CLS_PAD) unmasked store


# ---------------------------- params & packing ------------------------------


def init_params(key):
    ks = jax.random.split(key, 16)
    n = lambda k, shape: (0.02 * jax.random.normal(k, shape)).astype(jnp.float32)
    z = lambda shape: jnp.zeros(shape, jnp.float32)
    o = lambda shape: jnp.ones(shape, jnp.float32)
    return {
        "tok_emb": n(ks[0], (VOCAB, HIDDEN)),
        "seg_emb": n(ks[1], (SEG_TYPES, HIDDEN)),
        "pos_emb": n(ks[2], (MAX_SEQ, HIDDEN)),
        "ln_emb_g": o((HIDDEN,)), "ln_emb_b": z((HIDDEN,)),
        "wq": n(ks[3], (HIDDEN, HIDDEN)), "bq": z((HIDDEN,)),
        "wk": n(ks[4], (HIDDEN, HIDDEN)), "bk": z((HIDDEN,)),
        "wv": n(ks[5], (HIDDEN, HIDDEN)), "bv": z((HIDDEN,)),
        "wo": n(ks[6], (HIDDEN, HIDDEN)), "bo": z((HIDDEN,)),
        "ln1_g": o((HIDDEN,)), "ln1_b": z((HIDDEN,)),
        "w_ff1": n(ks[7], (HIDDEN, FFN_DIM)), "b_ff1": z((FFN_DIM,)),
        "w_ff2": n(ks[8], (FFN_DIM, HIDDEN)), "b_ff2": z((HIDDEN,)),
        "ln2_g": o((HIDDEN,)), "ln2_b": z((HIDDEN,)),
        "w_pool": n(ks[9], (HIDDEN, HIDDEN)), "b_pool": z((HIDDEN,)),
        "w_cls": n(ks[10], (HIDDEN, NUM_CLASSES)), "b_cls": z((NUM_CLASSES,)),
    }


def prepare_params(params):
    """One-time weight preprocessing, hoisted out of the per-call jitted forward."""
    H, F = HIDDEN, FFN_DIM
    scale = 1.0 / (HEAD_DIM ** 0.5)

    # Fused QKV with Q pre-scaled by 1/sqrt(DH) (deletes the in-kernel score multiply).
    w_qkv = jnp.concatenate([params["wq"] * scale, params["wk"], params["wv"]], axis=1)
    b_qkv = jnp.concatenate([params["bq"] * scale, params["bk"], params["bv"]])
    # Classifier padded to 128 lanes.
    w_cls = jnp.zeros((H, CLS_PAD), jnp.float32).at[:, :NUM_CLASSES].set(params["w_cls"])
    b_cls = jnp.zeros((CLS_PAD,), jnp.float32).at[:NUM_CLASSES].set(params["b_cls"])

    # bf16 weight slab: every K=HIDDEN weight side by side on the lane axis.
    w32 = jnp.zeros((H, W32_COLS), jnp.float32)
    w32 = w32.at[:, C_QKV:C_QKV + 3 * H].set(w_qkv)
    w32 = w32.at[:, C_O:C_O + H].set(params["wo"])
    w32 = w32.at[:, C_FF1:C_FF1 + F].set(params["w_ff1"])
    w32 = w32.at[:, C_POOL:C_POOL + H].set(params["w_pool"])
    w32 = w32.at[:, C_CLS:C_CLS + CLS_PAD].set(w_cls)

    # f32 table: one 128-lane row per bias / gamma / beta.
    vec = jnp.zeros((VEC_ROWS_PAD, VEC_COLS), jnp.float32)
    rows = [
        (R_LN_EMB_G, params["ln_emb_g"]), (R_LN_EMB_B, params["ln_emb_b"]),
        (R_B_QKV, b_qkv), (R_B_O, params["bo"]),
        (R_LN1_G, params["ln1_g"]), (R_LN1_B, params["ln1_b"]),
        (R_B_FF1, params["b_ff1"]), (R_B_FF2, params["b_ff2"]),
        (R_LN2_G, params["ln2_g"]), (R_LN2_B, params["ln2_b"]),
        (R_B_POOL, params["b_pool"]), (R_B_CLS, b_cls),
    ]
    for r, v in rows:
        vec = vec.at[r, :v.shape[0]].set(v)

    return {
        "w32": w32.astype(jnp.bfloat16),
        "wff2": params["w_ff2"].astype(jnp.bfloat16),
        "vec": vec,
        "tok_emb": params["tok_emb"],
        "seg_emb": params["seg_emb"],
        "pos_emb": params["pos_emb"],
    }


# -------------------------------- forward ----------------------------------


def bert_classifier_forward(prep, token_ids, valid_length, segment_ids):
    """Mirrors BERTClassifier.forward: mask gen -> bert(pooler) -> dropout -> classifier."""
    B, S = token_ids.shape
    H = HIDDEN
    Bt = min(BATCH_BLOCK, B)                       # examples stacked per grid step
    num_steps = -(-B // Bt)
    B_pad = num_steps * Bt
    R = Bt * S                                     # stacked rows per step

    # gen_attention_mask: key valid iff position < valid_length
    key_valid = (jnp.arange(S)[None, :] < valid_length[:, None]).astype(jnp.float32)   # (B, S)
    if B_pad > B:
        key_valid = jnp.concatenate(
            [key_valid, jnp.ones((B_pad - B, S), jnp.float32)], axis=0)
    key_valid = key_valid.reshape(num_steps, R)

    # Block-diagonal additive mask: kill cross-example blocks AND padded keys.
    ex = jnp.repeat(jnp.arange(Bt), S)                                                  # (R,)
    same_ex = (ex[:, None] == ex[None, :]).astype(jnp.float32)                          # (R, R)
    attn_bias = (1.0 - same_ex[None, :, :] * key_valid[:, None, :]) * -1e9              # (steps,R,R)

    # Embedding-table gathers stay in plain JAX; everything after is one fused kernel.
    emb = (prep["tok_emb"][token_ids]
           + prep["seg_emb"][segment_ids]
           + prep["pos_emb"][None, :S, :]).astype(jnp.float32)                          # (B, S, H)
    if B_pad > B:
        emb = jnp.concatenate([emb, jnp.zeros((B_pad - B, S, H), jnp.float32)], axis=0)
    emb_rows = emb.reshape(B_pad * S, H)

    out_rows = pl.pallas_call(
        _fused_bert_kernel,
        out_shape=jax.ShapeDtypeStruct((B_pad * S, CLS_PAD), jnp.float32),
        grid_spec=pltpu.PrefetchScalarGridSpec(
            num_scalar_prefetch=0,
            grid=(num_steps,),                                   # batch-block axis; independent work
            in_specs=[
                pl.BlockSpec((R, H), lambda i: (i, 0)),          # stacked embeddings
                pl.BlockSpec((1, R, R), lambda i: (i, 0, 0)),    # block-diag additive mask
                pl.BlockSpec((H, W32_COLS), lambda i: (0, 0)),   # bf16 weight slab (resident)
                pl.BlockSpec((FFN_DIM, H), lambda i: (0, 0)),    # bf16 w_ff2 (resident)
                pl.BlockSpec((VEC_ROWS_PAD, VEC_COLS), lambda i: (0, 0)),   # f32 bias table
            ],
            out_specs=pl.BlockSpec((R, CLS_PAD), lambda i: (i, 0)),
        ),
        compiler_params=pltpu.CompilerParams(
            dimension_semantics=("parallel",)),                  # shards batch blocks over v7x's 2 TCs
    )(emb_rows, attn_bias, prep["w32"], prep["wff2"], prep["vec"])

    # Select the [CLS] row of each (real) example, drop lane padding.
    return out_rows.reshape(B_pad, S, CLS_PAD)[:B, 0, :NUM_CLASSES]                     # (B, NUM_CLASSES)


if __name__ == "__main__":
    key = jax.random.PRNGKey(0)
    k_param, k_tok, k_seg = jax.random.split(key, 3)

    params = init_params(k_param)
    prep = prepare_params(params)          # one-time packing/padding/bf16, outside the jit

    B, S = 2, 8
    token_ids = jax.random.randint(k_tok, (B, S), 0, VOCAB, dtype=jnp.int32)
    segment_ids = jax.random.randint(k_seg, (B, S), 0, SEG_TYPES, dtype=jnp.int32)
    valid_length = jnp.array([8, 5], dtype=jnp.int32)

    fwd = jax.jit(bert_classifier_forward)
    logits = jax.block_until_ready(fwd(prep, token_ids, valid_length, segment_ids))

    assert logits.shape == (B, NUM_CLASSES) and logits.dtype == jnp.float32
    assert bool(jnp.all(jnp.isfinite(logits)))
    print("KERNEL_OK")
</pallas_src>

<mosaic_0001>
module attributes {stable_mosaic.version = 11 : i64} {
  func.func @_fused_bert_kernel(%arg0: i32, %arg1: memref<16x32xf32, #tpu.memory_space<vmem>>, %arg2: memref<1x16x16xf32, #tpu.memory_space<vmem>>, %arg3: memref<32x384xbf16, #tpu.memory_space<vmem>>, %arg4: memref<64x32xbf16, #tpu.memory_space<vmem>>, %arg5: memref<16x128xf32, #tpu.memory_space<vmem>>, %arg6: memref<16x128xf32, #tpu.memory_space<vmem>>) attributes {dimension_semantics = [#tpu.dimension_semantics<parallel>], iteration_bounds = array<i64: 1>, scalar_prefetch = 0 : i64, scratch_operands = 0 : i64, tpu.core_type = #tpu.core_type<tc>, window_params = [{transform_indices = @transform_0, window_bounds = array<i64: 16, 32>}, {transform_indices = @transform_1, window_bounds = array<i64: 1, 16, 16>}, {pipeline_mode = #tpu.pipeline_mode<synchronous>, transform_indices = @transform_2, window_bounds = array<i64: 32, 384>}, {pipeline_mode = #tpu.pipeline_mode<synchronous>, transform_indices = @transform_3, window_bounds = array<i64: 64, 32>}, {pipeline_mode = #tpu.pipeline_mode<synchronous>, transform_indices = @transform_4, window_bounds = array<i64: 16, 128>}, {transform_indices = @transform_5, window_bounds = array<i64: 16, 128>}]} {
    %c0 = arith.constant 0 : index
    %c0_0 = arith.constant 0 : index
    %0 = vector.load %arg1[%c0, %c0_0] : memref<16x32xf32, #tpu.memory_space<vmem>>, vector<16x32xf32>
    %cst = arith.constant dense<0.000000e+00> : vector<16xf32>
    %1 = vector.multi_reduction <add>, %0, %cst [1] : vector<16x32xf32> to vector<16xf32>
    %2 = vector.shape_cast %1 : vector<16xf32> to vector<16x1xf32>
    %cst_1 = arith.constant 3.200000e+01 : f32
    %3 = vector.broadcast %cst_1 : f32 to vector<16x1xf32>
    %4 = arith.divf %2, %3 : vector<16x1xf32>
    %5 = arith.mulf %0, %0 : vector<16x32xf32>
    %cst_2 = arith.constant dense<0.000000e+00> : vector<16xf32>
    %6 = vector.multi_reduction <add>, %5, %cst_2 [1] : vector<16x32xf32> to vector<16xf32>
    %7 = vector.shape_cast %6 : vector<16xf32> to vector<16x1xf32>
    %cst_3 = arith.constant 3.200000e+01 : f32
    %8 = vector.broadcast %cst_3 : f32 to vector<16x1xf32>
    %9 = arith.divf %7, %8 : vector<16x1xf32>
    %10 = arith.mulf %4, %4 : vector<16x1xf32>
    %11 = arith.subf %9, %10 : vector<16x1xf32>
    %cst_4 = arith.constant 0.000000e+00 : f32
    %12 = vector.broadcast %cst_4 : f32 to vector<16x1xf32>
    %13 = arith.maximumf %11, %12 : vector<16x1xf32>
    %14 = vector.broadcast %4 : vector<16x1xf32> to vector<16x32xf32>
    %15 = arith.subf %0, %14 : vector<16x32xf32>
    %cst_5 = arith.constant 9.99999996E-13 : f32
    %16 = vector.broadcast %cst_5 : f32 to vector<16x1xf32>
    %17 = arith.addf %13, %16 : vector<16x1xf32>
    %18 = math.rsqrt %17 : vector<16x1xf32>
    %19 = vector.broadcast %18 : vector<16x1xf32> to vector<16x32xf32>
    %20 = arith.mulf %15, %19 : vector<16x32xf32>
    %c0_6 = arith.constant 0 : index
    %c0_7 = arith.constant 0 : index
    %21 = vector.load %arg5[%c0_6, %c0_7] : memref<16x128xf32, #tpu.memory_space<vmem>>, vector<1x32xf32>
    %22 = vector.broadcast %21 : vector<1x32xf32> to vector<16x32xf32>
    %23 = arith.mulf %20, %22 : vector<16x32xf32>
    %c1 = arith.constant 1 : index
    %c0_8 = arith.constant 0 : index
    %24 = vector.load %arg5[%c1, %c0_8] : memref<16x128xf32, #tpu.memory_space<vmem>>, vector<1x32xf32>
    %25 = vector.broadcast %24 : vector<1x32xf32> to vector<16x32xf32>
    %26 = arith.addf %23, %25 : vector<16x32xf32>
    %c0_9 = arith.constant 0 : index
    %c0_10 = arith.constant 0 : index
    %c0_11 = arith.constant 0 : index
    %27 = vector.load %arg2[%c0_9, %c0_10, %c0_11] : memref<1x16x16xf32, #tpu.memory_space<vmem>>, vector<1x16x16xf32>
    %28 = vector.shape_cast %27 : vector<1x16x16xf32> to vector<16x16xf32>
    %c0_12 = arith.constant 0 : index
    %c0_13 = arith.constant 0 : index
    %29 = vector.load %arg3[%c0_12, %c0_13] : memref<32x384xbf16, #tpu.memory_space<vmem>>, vector<32x96xbf16>
    %30 = arith.truncf %26 : vector<16x32xf32> to vector<16x32xbf16>
    %cst_14 = arith.constant dense<0.000000e+00> : vector<16x96xf32>
    %31 = tpu.matmul %30, %29, %cst_14 {dimension_numbers = #tpu.dot_dimension_numbers<[1], [0], [0], [1], [0, 0, 1, 1], [], []>} : vector<16x32xbf16>, vector<32x96xbf16>, vector<16x96xf32> -> vector<16x96xf32>
    %c2 = arith.constant 2 : index
    %c0_15 = arith.constant 0 : index
    %32 = vector.load %arg5[%c2, %c0_15] : memref<16x128xf32, #tpu.memory_space<vmem>>, vector<1x96xf32>
    %33 = vector.broadcast %32 : vector<1x96xf32> to vector<16x96xf32>
    %34 = arith.addf %31, %33 : vector<16x96xf32>
    %cst_16 = arith.constant 0.000000e+00 : f32
    %35 = vector.broadcast %cst_16 : f32 to vector<16x32xf32>
    %36 = vector.extract_strided_slice %34 {offsets = [0, 0], sizes = [16, 16], strides = [1, 1]} : vector<16x96xf32> to vector<16x16xf32>
    %37 = vector.extract_strided_slice %34 {offsets = [0, 32], sizes = [16, 16], strides = [1, 1]} : vector<16x96xf32> to vector<16x16xf32>
    %38 = vector.extract_strided_slice %34 {offsets = [0, 64], sizes = [16, 16], strides = [1, 1]} : vector<16x96xf32> to vector<16x16xf32>
    %39 = arith.truncf %36 : vector<16x16xf32> to vector<16x16xbf16>
    %40 = arith.truncf %37 : vector<16x16xf32> to vector<16x16xbf16>
    %cst_17 = arith.constant dense<0.000000e+00> : vector<16x16xf32>
    %41 = tpu.matmul %39, %40, %cst_17 {dimension_numbers = #tpu.dot_dimension_numbers<[1], [1], [0], [0], [0, 0, 1, 0], [], []>} : vector<16x16xbf16>, vector<16x16xbf16>, vector<16x16xf32> -> vector<16x16xf32>
    %42 = arith.addf %41, %28 : vector<16x16xf32>
    %cst_18 = arith.constant dense<0xFF800000> : vector<16xf32>
    %43 = vector.multi_reduction <maximumf>, %42, %cst_18 [1] : vector<16x16xf32> to vector<16xf32>
    %44 = vector.shape_cast %43 : vector<16xf32> to vector<16x1xf32>
    %45 = vector.broadcast %44 : vector<16x1xf32> to vector<16x16xf32>
    %46 = arith.subf %42, %45 : vector<16x16xf32>
    %47 = math.exp %46 : vector<16x16xf32>
    %cst_19 = arith.constant dense<0.000000e+00> : vector<16xf32>
    %48 = vector.multi_reduction <add>, %47, %cst_19 [1] : vector<16x16xf32> to vector<16xf32>
    %49 = vector.shape_cast %48 : vector<16xf32> to vector<16x1xf32>
    %50 = tpu.reciprocal %49 {approx = true} : vector<16x1xf32> -> vector<16x1xf32>
    %51 = vector.broadcast %50 : vector<16x1xf32> to vector<16x16xf32>
    %52 = arith.mulf %47, %51 : vector<16x16xf32>
    %53 = arith.truncf %52 : vector<16x16xf32> to vector<16x16xbf16>
    %54 = arith.truncf %38 : vector<16x16xf32> to vector<16x16xbf16>
    %cst_20 = arith.constant dense<0.000000e+00> : vector<16x16xf32>
    %55 = tpu.matmul %53, %54, %cst_20 {dimension_numbers = #tpu.dot_dimension_numbers<[1], [0], [0], [1], [0, 0, 1, 1], [], []>} : vector<16x16xbf16>, vector<16x16xbf16>, vector<16x16xf32> -> vector<16x16xf32>
    %56 = arith.truncf %55 : vector<16x16xf32> to vector<16x16xbf16>
    %c0_21 = arith.constant 0 : index
    %c96 = arith.constant 96 : index
    %57 = vector.load %arg3[%c0_21, %c96] : memref<32x384xbf16, #tpu.memory_space<vmem>>, vector<16x32xbf16>
    %cst_22 = arith.constant dense<0.000000e+00> : vector<16x32xf32>
    %58 = tpu.matmul %56, %57, %cst_22 {dimension_numbers = #tpu.dot_dimension_numbers<[1], [0], [0], [1], [0, 0, 1, 1], [], []>} : vector<16x16xbf16>, vector<16x32xbf16>, vector<16x32xf32> -> vector<16x32xf32>
    %59 = arith.addf %35, %58 : vector<16x32xf32>
    %60 = vector.extract_strided_slice %34 {offsets = [0, 16], sizes = [16, 16], strides = [1, 1]} : vector<16x96xf32> to vector<16x16xf32>
    %61 = vector.extract_strided_slice %34 {offsets = [0, 48], sizes = [16, 16], strides = [1, 1]} : vector<16x96xf32> to vector<16x16xf32>
    %62 = vector.extract_strided_slice %34 {offsets = [0, 80], sizes = [16, 16], strides = [1, 1]} : vector<16x96xf32> to vector<16x16xf32>
    %63 = arith.truncf %60 : vector<16x16xf32> to vector<16x16xbf16>
    %64 = arith.truncf %61 : vector<16x16xf32> to vector<16x16xbf16>
    %cst_23 = arith.constant dense<0.000000e+00> : vector<16x16xf32>
    %65 = tpu.matmul %63, %64, %cst_23 {dimension_numbers = #tpu.dot_dimension_numbers<[1], [1], [0], [0], [0, 0, 1, 0], [], []>} : vector<16x16xbf16>, vector<16x16xbf16>, vector<16x16xf32> -> vector<16x16xf32>
    %66 = arith.addf %65, %28 : vector<16x16xf32>
    %cst_24 = arith.constant dense<0xFF800000> : vector<16xf32>
    %67 = vector.multi_reduction <maximumf>, %66, %cst_24 [1] : vector<16x16xf32> to vector<16xf32>
    %68 = vector.shape_cast %67 : vector<16xf32> to vector<16x1xf32>
    %69 = vector.broadcast %68 : vector<16x1xf32> to vector<16x16xf32>
    %70 = arith.subf %66, %69 : vector<16x16xf32>
    %71 = math.exp %70 : vector<16x16xf32>
    %cst_25 = arith.constant dense<0.000000e+00> : vector<16xf32>
    %72 = vector.multi_reduction <add>, %71, %cst_25 [1] : vector<16x16xf32> to vector<16xf32>
    %73 = vector.shape_cast %72 : vector<16xf32> to vector<16x1xf32>
    %74 = tpu.reciprocal %73 {approx = true} : vector<16x1xf32> -> vector<16x1xf32>
    %75 = vector.broadcast %74 : vector<16x1xf32> to vector<16x16xf32>
    %76 = arith.mulf %71, %75 : vector<16x16xf32>
    %77 = arith.truncf %76 : vector<16x16xf32> to vector<16x16xbf16>
    %78 = arith.truncf %62 : vector<16x16xf32> to vector<16x16xbf16>
    %cst_26 = arith.constant dense<0.000000e+00> : vector<16x16xf32>
    %79 = tpu.matmul %77, %78, %cst_26 {dimension_numbers = #tpu.dot_dimension_numbers<[1], [0], [0], [1], [0, 0, 1, 1], [], []>} : vector<16x16xbf16>, vector<16x16xbf16>, vector<16x16xf32> -> vector<16x16xf32>
    %80 = arith.truncf %79 : vector<16x16xf32> to vector<16x16xbf16>
    %c16 = arith.constant 16 : index
    %c96_27 = arith.constant 96 : index
    %81 = vector.load %arg3[%c16, %c96_27] : memref<32x384xbf16, #tpu.memory_space<vmem>>, vector<16x32xbf16>
    %cst_28 = arith.constant dense<0.000000e+00> : vector<16x32xf32>
    %82 = tpu.matmul %80, %81, %cst_28 {dimension_numbers = #tpu.dot_dimension_numbers<[1], [0], [0], [1], [0, 0, 1, 1], [], []>} : vector<16x16xbf16>, vector<16x32xbf16>, vector<16x32xf32> -> vector<16x32xf32>
    %83 = arith.addf %59, %82 : vector<16x32xf32>
    %84 = arith.addf %26, %83 : vector<16x32xf32>
    %c3 = arith.constant 3 : index
    %c0_29 = arith.constant 0 : index
    %85 = vector.load %arg5[%c3, %c0_29] : memref<16x128xf32, #tpu.memory_space<vmem>>, vector<1x32xf32>
    %86 = vector.broadcast %85 : vector<1x32xf32> to vector<16x32xf32>
    %87 = arith.addf %84, %86 : vector<16x32xf32>
    %cst_30 = arith.constant dense<0.000000e+00> : vector<16xf32>
    %88 = vector.multi_reduction <add>, %87, %cst_30 [1] : vector<16x32xf32> to vector<16xf32>
    %89 = vector.shape_cast %88 : vector<16xf32> to vector<16x1xf32>
    %cst_31 = arith.constant 3.200000e+01 : f32
    %90 = vector.broadcast %cst_31 : f32 to vector<16x1xf32>
    %91 = arith.divf %89, %90 : vector<16x1xf32>
    %92 = arith.mulf %87, %87 : vector<16x32xf32>
    %cst_32 = arith.constant dense<0.000000e+00> : vector<16xf32>
    %93 = vector.multi_reduction <add>, %92, %cst_32 [1] : vector<16x32xf32> to vector<16xf32>
    %94 = vector.shape_cast %93 : vector<16xf32> to vector<16x1xf32>
    %cst_33 = arith.constant 3.200000e+01 : f32
    %95 = vector.broadcast %cst_33 : f32 to vector<16x1xf32>
    %96 = arith.divf %94, %95 : vector<16x1xf32>
    %97 = arith.mulf %91, %91 : vector<16x1xf32>
    %98 = arith.subf %96, %97 : vector<16x1xf32>
    %cst_34 = arith.constant 0.000000e+00 : f32
    %99 = vector.broadcast %cst_34 : f32 to vector<16x1xf32>
    %100 = arith.maximumf %98, %99 : vector<16x1xf32>
    %101 = vector.broadcast %91 : vector<16x1xf32> to vector<16x32xf32>
    %102 = arith.subf %87, %101 : vector<16x32xf32>
    %cst_35 = arith.constant 9.99999996E-13 : f32
    %103 = vector.broadcast %cst_35 : f32 to vector<16x1xf32>
    %104 = arith.addf %100, %103 : vector<16x1xf32>
    %105 = math.rsqrt %104 : vector<16x1xf32>
    %106 = vector.broadcast %105 : vector<16x1xf32> to vector<16x32xf32>
    %107 = arith.mulf %102, %106 : vector<16x32xf32>
    %c4 = arith.constant 4 : index
    %c0_36 = arith.constant 0 : index
    %108 = vector.load %arg5[%c4, %c0_36] : memref<16x128xf32, #tpu.memory_space<vmem>>, vector<1x32xf32>
    %109 = vector.broadcast %108 : vector<1x32xf32> to vector<16x32xf32>
    %110 = arith.mulf %107, %109 : vector<16x32xf32>
    %c5 = arith.constant 5 : index
    %c0_37 = arith.constant 0 : index
    %111 = vector.load %arg5[%c5, %c0_37] : memref<16x128xf32, #tpu.memory_space<vmem>>, vector<1x32xf32>
    %112 = vector.broadcast %111 : vector<1x32xf32> to vector<16x32xf32>
    %113 = arith.addf %110, %112 : vector<16x32xf32>
    %c0_38 = arith.constant 0 : index
    %c128 = arith.constant 128 : index
    %114 = vector.load %arg3[%c0_38, %c128] : memref<32x384xbf16, #tpu.memory_space<vmem>>, vector<32x64xbf16>
    %115 = arith.truncf %113 : vector<16x32xf32> to vector<16x32xbf16>
    %cst_39 = arith.constant dense<0.000000e+00> : vector<16x64xf32>
    %116 = tpu.matmul %115, %114, %cst_39 {dimension_numbers = #tpu.dot_dimension_numbers<[1], [0], [0], [1], [0, 0, 1, 1], [], []>} : vector<16x32xbf16>, vector<32x64xbf16>, vector<16x64xf32> -> vector<16x64xf32>
    %c6 = arith.constant 6 : index
    %c0_40 = arith.constant 0 : index
    %117 = vector.load %arg5[%c6, %c0_40] : memref<16x128xf32, #tpu.memory_space<vmem>>, vector<1x64xf32>
    %118 = vector.broadcast %117 : vector<1x64xf32> to vector<16x64xf32>
    %119 = arith.addf %116, %118 : vector<16x64xf32>
    %120 = arith.mulf %119, %119 : vector<16x64xf32>
    %121 = arith.mulf %119, %120 : vector<16x64xf32>
    %cst_41 = arith.constant 4.471500e-02 : f32
    %122 = vector.broadcast %cst_41 : f32 to vector<16x64xf32>
    %123 = arith.mulf %122, %121 : vector<16x64xf32>
    %124 = arith.addf %119, %123 : vector<16x64xf32>
    %cst_42 = arith.constant 0.797884583 : f32
    %125 = vector.broadcast %cst_42 : f32 to vector<16x64xf32>
    %126 = arith.mulf %125, %124 : vector<16x64xf32>
    %127 = math.tanh %126 : vector<16x64xf32>
    %cst_43 = arith.constant 1.000000e+00 : f32
    %128 = vector.broadcast %cst_43 : f32 to vector<16x64xf32>
    %129 = arith.addf %128, %127 : vector<16x64xf32>
    %cst_44 = arith.constant 5.000000e-01 : f32
    %130 = vector.broadcast %cst_44 : f32 to vector<16x64xf32>
    %131 = arith.mulf %130, %129 : vector<16x64xf32>
    %132 = arith.mulf %119, %131 : vector<16x64xf32>
    %133 = arith.truncf %132 : vector<16x64xf32> to vector<16x64xbf16>
    %c0_45 = arith.constant 0 : index
    %c0_46 = arith.constant 0 : index
    %134 = vector.load %arg4[%c0_45, %c0_46] : memref<64x32xbf16, #tpu.memory_space<vmem>>, vector<64x32xbf16>
    %cst_47 = arith.constant dense<0.000000e+00> : vector<16x32xf32>
    %135 = tpu.matmul %133, %134, %cst_47 {dimension_numbers = #tpu.dot_dimension_numbers<[1], [0], [0], [1], [0, 0, 1, 1], [], []>} : vector<16x64xbf16>, vector<64x32xbf16>, vector<16x32xf32> -> vector<16x32xf32>
    %c7 = arith.constant 7 : index
    %c0_48 = arith.constant 0 : index
    %136 = vector.load %arg5[%c7, %c0_48] : memref<16x128xf32, #tpu.memory_space<vmem>>, vector<1x32xf32>
    %137 = vector.broadcast %136 : vector<1x32xf32> to vector<16x32xf32>
    %138 = arith.addf %135, %137 : vector<16x32xf32>
    %139 = arith.addf %113, %138 : vector<16x32xf32>
    %cst_49 = arith.constant dense<0.000000e+00> : vector<16xf32>
    %140 = vector.multi_reduction <add>, %139, %cst_49 [1] : vector<16x32xf32> to vector<16xf32>
    %141 = vector.shape_cast %140 : vector<16xf32> to vector<16x1xf32>
    %cst_50 = arith.constant 3.200000e+01 : f32
    %142 = vector.broadcast %cst_50 : f32 to vector<16x1xf32>
    %143 = arith.divf %141, %142 : vector<16x1xf32>
    %144 = arith.mulf %139, %139 : vector<16x32xf32>
    %cst_51 = arith.constant dense<0.000000e+00> : vector<16xf32>
    %145 = vector.multi_reduction <add>, %144, %cst_51 [1] : vector<16x32xf32> to vector<16xf32>
    %146 = vector.shape_cast %145 : vector<16xf32> to vector<16x1xf32>
    %cst_52 = arith.constant 3.200000e+01 : f32
    %147 = vector.broadcast %cst_52 : f32 to vector<16x1xf32>
    %148 = arith.divf %146, %147 : vector<16x1xf32>
    %149 = arith.mulf %143, %143 : vector<16x1xf32>
    %150 = arith.subf %148, %149 : vector<16x1xf32>
    %cst_53 = arith.constant 0.000000e+00 : f32
    %151 = vector.broadcast %cst_53 : f32 to vector<16x1xf32>
    %152 = arith.maximumf %150, %151 : vector<16x1xf32>
    %153 = vector.broadcast %143 : vector<16x1xf32> to vector<16x32xf32>
    %154 = arith.subf %139, %153 : vector<16x32xf32>
    %cst_54 = arith.constant 9.99999996E-13 : f32
    %155 = vector.broadcast %cst_54 : f32 to vector<16x1xf32>
    %156 = arith.addf %152, %155 : vector<16x1xf32>
    %157 = math.rsqrt %156 : vector<16x1xf32>
    %158 = vector.broadcast %157 : vector<16x1xf32> to vector<16x32xf32>
    %159 = arith.mulf %154, %158 : vector<16x32xf32>
    %c8 = arith.constant 8 : index
    %c0_55 = arith.constant 0 : index
    %160 = vector.load %arg5[%c8, %c0_55] : memref<16x128xf32, #tpu.memory_space<vmem>>, vector<1x32xf32>
    %161 = vector.broadcast %160 : vector<1x32xf32> to vector<16x32xf32>
    %162 = arith.mulf %159, %161 : vector<16x32xf32>
    %c9 = arith.constant 9 : index
    %c0_56 = arith.constant 0 : index
    %163 = vector.load %arg5[%c9, %c0_56] : memref<16x128xf32, #tpu.memory_space<vmem>>, vector<1x32xf32>
    %164 = vector.broadcast %163 : vector<1x32xf32> to vector<16x32xf32>
    %165 = arith.addf %162, %164 : vector<16x32xf32>
    %c0_57 = arith.constant 0 : index
    %c192 = arith.constant 192 : index
    %166 = vector.load %arg3[%c0_57, %c192] : memref<32x384xbf16, #tpu.memory_space<vmem>>, vector<32x32xbf16>
    %167 = arith.truncf %165 : vector<16x32xf32> to vector<16x32xbf16>
    %cst_58 = arith.constant dense<0.000000e+00> : vector<16x32xf32>
    %168 = tpu.matmul %167, %166, %cst_58 {dimension_numbers = #tpu.dot_dimension_numbers<[1], [0], [0], [1], [0, 0, 1, 1], [], []>} : vector<16x32xbf16>, vector<32x32xbf16>, vector<16x32xf32> -> vector<16x32xf32>
    %c10 = arith.constant 10 : index
    %c0_59 = arith.constant 0 : index
    %169 = vector.load %arg5[%c10, %c0_59] : memref<16x128xf32, #tpu.memory_space<vmem>>, vector<1x32xf32>
    %170 = vector.broadcast %169 : vector<1x32xf32> to vector<16x32xf32>
    %171 = arith.addf %168, %170 : vector<16x32xf32>
    %172 = math.tanh %171 : vector<16x32xf32>
    %c0_60 = arith.constant 0 : index
    %c224 = arith.constant 224 : index
    %173 = vector.load %arg3[%c0_60, %c224] : memref<32x384xbf16, #tpu.memory_space<vmem>>, vector<32x128xbf16>
    %174 = arith.truncf %172 : vector<16x32xf32> to vector<16x32xbf16>
    %cst_61 = arith.constant dense<0.000000e+00> : vector<16x128xf32>
    %175 = tpu.matmul %174, %173, %cst_61 {dimension_numbers = #tpu.dot_dimension_numbers<[1], [0], [0], [1], [0, 0, 1, 1], [], []>} : vector<16x32xbf16>, vector<32x128xbf16>, vector<16x128xf32> -> vector<16x128xf32>
    %c11 = arith.constant 11 : index
    %c0_62 = arith.constant 0 : index
    %176 = vector.load %arg5[%c11, %c0_62] : memref<16x128xf32, #tpu.memory_space<vmem>>, vector<1x128xf32>
    %177 = vector.broadcast %176 : vector<1x128xf32> to vector<16x128xf32>
    %178 = arith.addf %175, %177 : vector<16x128xf32>
    %c0_63 = arith.constant 0 : index
    %c0_64 = arith.constant 0 : index
    %179 = vector.load %arg6[%c0_63, %c0_64] : memref<16x128xf32, #tpu.memory_space<vmem>>, vector<16x128xf32>
    tpu.vector_store %arg6[%c0_63, %c0_64], %178 {strides = array<i32>} : memref<16x128xf32, #tpu.memory_space<vmem>>, vector<16x128xf32>,
    return
  }
  func.func @transform_0(%arg0: i32) -> (i32, i32) {
    %c0_i32 = arith.constant 0 : i32
    %c0_i32_0 = arith.constant 0 : i32
    return %arg0, %c0_i32 : i32, i32
  }
  func.func @transform_1(%arg0: i32) -> (i32, i32, i32) {
    %c0_i32 = arith.constant 0 : i32
    %c0_i32_0 = arith.constant 0 : i32
    %c0_i32_1 = arith.constant 0 : i32
    return %arg0, %c0_i32, %c0_i32_0 : i32, i32, i32
  }
  func.func @transform_2(%arg0: i32) -> (i32, i32) {
    %c0_i32 = arith.constant 0 : i32
    %c0_i32_0 = arith.constant 0 : i32
    %c0_i32_1 = arith.constant 0 : i32
    return %c0_i32, %c0_i32_0 : i32, i32
  }
  func.func @transform_3(%arg0: i32) -> (i32, i32) {
    %c0_i32 = arith.constant 0 : i32
    %c0_i32_0 = arith.constant 0 : i32
    %c0_i32_1 = arith.constant 0 : i32
    return %c0_i32, %c0_i32_0 : i32, i32
  }
  func.func @transform_4(%arg0: i32) -> (i32, i32) {
    %c0_i32 = arith.constant 0 : i32
    %c0_i32_0 = arith.constant 0 : i32
    %c0_i32_1 = arith.constant 0 : i32
    return %c0_i32, %c0_i32_0 : i32, i32
  }
  func.func @transform_5(%arg0: i32) -> (i32, i32) {
    %c0_i32 = arith.constant 0 : i32
    %c0_i32_0 = arith.constant 0 : i32
    return %arg0, %c0_i32 : i32, i32
  }
}

</mosaic_0001>

<bundles_post_ra>
// kernel: bert_classifier_forward.1
= control target key start
LH: loop header
LB: loop body
LE: loop exit
PB: predicated region body
PF: predicated region fallthrough
CT: control target
= control target key end

     0   :  { %vm23_vm0 = vcmask 261120   ;;  %v1106_v8 = vmov 0.0   ;;  %vm1107_vm1 = vmmov 0   ;;  %s1108_s6 = smov 80   ;;  %s1109_s7 = smov 96   ;;  %vm143_vm2 = vcmask 130048   ;;  %s1348_s0 = inlined_call_operand.vmem [shape: f32[16,32], index: 0, kind: input, shape index: {}]   ;;  %s1349_s2 = inlined_call_operand.vmem [shape: bf16[32,384], index: 2, kind: input, shape index: {}]   ;;  %s1350_s4 = inlined_call_operand.vmem [shape: f32[16,128], index: 4, kind: input, shape index: {}]   ;;  %s1351_s1 = inlined_call_operand.vmem [shape: f32[1,16,16], index: 1, kind: input, shape index: {}]   ;;  %s1352_s3 = inlined_call_operand.vmem [shape: bf16[64,32], index: 3, kind: input, shape index: {}]   ;;  %s1353_s5 = inlined_call_operand.vmem [shape: f32[16,128], index: 5, kind: output, shape index: {}]  }
   0x1   :  { %v21_v0 = vld [vmem:[%s1348_s0] sm:$0xff]  ;;  %v22_v1 = vld [vmem:[%s1348_s0 + $0x8] sm:$0xff]  ;;  %967 = vmatprep.subr.bf16.mxu0 %v1106_v8  ;;  %971 = vmatprep.mubr.msk.bf16.mxu0 %vm1107_vm1, %v1106_v8  ;;  %s1110_s8 = smov 112   ;;  %s1112_s13 = smov 48   ;;  %vm662_vm3 = vcmask 523264  }
   0x2   :  { %v24_v2 = vsel %vm23_vm0, %v21_v0, 0.0  ;;  %v33_v3 = vmul.f32 %v21_v0, %v21_v0  ;;  %v34_v4 = vmul.f32 %v22_v1, %v22_v1  ;;  %v27_v6 = vsel %vm23_vm0, %v22_v1, 0.0  ;;  %v1055_v9 = vld [vmem:[%s1349_s2] ss:$12 sps:$4 sm:$0xff]   ;;  %v1163_v10 = vld [vmem:[%s1349_s2 + $0x18] ss:$12 sps:$4 sm:$0xff]   ;;  %975 = vmatprep.subr.bf16.mxu1 %v1106_v8  ;;  %977 = vmatprep.mubr.msk.bf16.mxu1 %vm1107_vm1, %v1106_v8 }
   0x3   :  { %25 = vadd.xlane.f32.xlu0 %v24_v2  ;;  %968 = vmatpush3.bf16.msra.mxu0 %v1055_v9  ;;  %v902_v30 = vld [vmem:[%s1350_s4] ss:$0 sm:$0xff]  ;;  %v903_v35 = vld [vmem:[%s1350_s4 + $0x1] ss:$0 sm:$0xff]  ;;  %v904_v40 = vld [vmem:[%s1350_s4 + $0x2] ss:$0 sm:$0xff] }
   0x4   :  { %v35_v5 = vsel %vm23_vm0, %v33_v3, 0.0  ;;  %v38_v7 = vsel %vm23_vm0, %v34_v4, 0.0  ;;  %969 = vmatprep.subr.bf16.mxu0 %v1106_v8  ;;  %v71_v53 = vld [vmem:[%s1351_s1] sm:$0xff]  ;;  %v72_v55 = vld [vmem:[%s1351_s1 + $0x8] sm:$0xff]  ;;  %s1111_s1 = smov 64   ;;  %s1113_s14 = smov 32  }
   0x5   :  { %36 = vadd.xlane.f32.xlu1 %v35_v5 }
   0x7   :  { %28 = vadd.xlane.f32.xlu0 %v27_v6  ;;  %970 = vmatpush3.bf16.msra.mxu0 %v1163_v10 }
   0x8   :  { %981 = vmatprep.subr.bf16.mxu0 %v1106_v8 }
   0x9   :  { %39 = vadd.xlane.f32.xlu1 %v38_v7 }
  0x90   :  { %v26_v11 = vpop.xlane.xlu0 %25 }
  0x91   :  { %v31_v12 = vmul.f32 0.03125, %v26_v11 }
  0x92   :  { %v37_v13 = vpop.xlane.xlu1 %36 }
  0x93   :  { %v43_v14 = vmul.f32 %v31_v12, %v31_v12  ;;  %v41_v15 = vmul.f32 0.03125, %v37_v13  ;;  %v49_v27 = vsub.f32 %v21_v0, %v31_v12 }
  0x94   :  { %v29_v16 = vpop.xlane.xlu0 %28 }
  0x95   :  { %v45_v17 = vsub.f32 %v41_v15, %v43_v14  ;;  %v32_v18 = vmul.f32 0.03125, %v29_v16 }
  0x96   :  { %v40_v19 = vpop.xlane.xlu1 %39 }
  0x97   :  { %v47_v20 = vmax.f32 %v45_v17, 0.0  ;;  %v44_v21 = vmul.f32 %v32_v18, %v32_v18  ;;  %v42_v22 = vmul.f32 0.03125, %v40_v19  ;;  %v50_v31 = vsub.f32 %v22_v1, %v32_v18 }
  0x99   :  { %v51_v23 = vadd.f32 1e-12, %v47_v20  ;;  %v46_v24 = vsub.f32 %v42_v22, %v44_v21 }
  0x9b   :  { %1070 = vrsqrt.f32 %v51_v23  ;;  %v48_v25 = vmax.f32 %v46_v24, 0.0 }
  0x9d   :  { %v52_v26 = vadd.f32 1e-12, %v48_v25 }
  0x9f   :  { %1072 = vrsqrt.f32 %v52_v26 }
  0xa5   :  { %v1071_v28 = vpop.eup %1070 }
  0xa6   :  { %v55_v29 = vmul.f32 %v1071_v28, %v49_v27 }
  0xa8   :  { %v62_v34 = vmul.f32 %v902_v30, %v55_v29  ;;  %v1057_v29 = vld [vmem:[%s1349_s2] ss:$12 sps:$4 sm:$0xff]  }
  0xa9   :  { %v1073_v32 = vpop.eup %1072 }
  0xaa   :  { %v56_v33 = vmul.f32 %v1073_v32, %v50_v31  ;;  %v1177_v37 = vadd.f32 %v903_v35, %v62_v34 }
  0xac   :  { %v63_v36 = vmul.f32 %v902_v30, %v56_v33 }
  0xae   :  { %v1179_v38 = vadd.f32 %v903_v35, %v63_v36 }
  0xb0   :  { %v77_v39 = vpack.c.bf16 %v1179_v38, %v1177_v37 }
  0xb2   :  { %972 = vmatmul.mubr.msk.bf16.vlgmr.msra.gmra.mrb[0].mxu0 %vm23_vm0, %v77_v39 }
  0xb3   :  { %983 = vmatprep.mubr.msk.bf16.mxu0 %vm1107_vm1, %v1106_v8 }
 0x185   :  { %v132_v41 = vpop.f32.mrb[0].mxu0 }
 0x186   :  { %v973_v42 = vpop.f32.mrb[1].mxu0  ;;  %v133_v44 = vadd.f32 %v904_v40, %v132_v41 }
 0x187   :  { %v135_v43 = vpop.f32.mrb[2].mxu0 }
 0x188   :  { %v136_v45 = vadd.f32 %v904_v40, %v135_v43  ;;  %v974_v46 = vpop.f32.mrb[3].mxu0 }
 0x18a   :  { %v1189_v47 = vpack.c.bf16 %v136_v45, %v133_v44 }
 0x18c   :  { %266 = vrot.lane.b32.xlu1 %v1189_v47, %s1108_s6  ;;  %141 = vrot.lane.b32.xlu0 %v1189_v47, %s1109_s7 }
 0x190   :  { %264 = vrot.lane.b32.xlu1 %v1189_v47, %s1110_s8 }
 0x1fe   :  { %v142_v48 = vpop.permute.xlu0 %141  ;;  %v267_v50 = vpop.permute.xlu1 %266 }
 0x1ff   :  { %v148_v49 = vsel %vm143_vm2, %v142_v48, 0  ;;  %v272_v51 = vsel %vm143_vm2, %v267_v50, 0 }
 0x200   :  { %976 = vmatpush3.bf16.xpose.msra.mxu1 %v148_v49 }
 0x201   :  { %987 = vmatprep.subr.bf16.mxu1 %v1106_v8 }
 0x202   :  { %v265_v52 = vpop.permute.xlu1 %264 }
 0x207   :  { %978 = vmatmul.mubr.msk.bf16.vlgmr.msra.gmra.mrb[0].mxu1 %vm143_vm2, %v1189_v47 }
 0x208   :  { %988 = vmatpush3.bf16.xpose.msra.mxu1 %v272_v51  ;;  %989 = vmatprep.mubr.msk.bf16.mxu1 %vm1107_vm1, %v1106_v8 }
 0x209   :  { %999 = vmatprep.subr.bf16.mxu1 %v1106_v8 }
 0x20f   :  { %990 = vmatmul.mubr.msk.bf16.vlgmr.msra.gmra.mrb[4].mxu1 %vm143_vm2, %v265_v52 }
 0x210   :  { %1001 = vmatprep.mubr.msk.bf16.mxu1 %vm1107_vm1, %v1106_v8 }
 0x2da   :  { %v184_v54 = vpop.f32.mrb[0].mxu1 }
 0x2db   :  { %v185_v56 = vadd.f32 %v184_v54, %v71_v53  ;;  %v979_v57 = vpop.f32.mrb[1].mxu1 }
 0x2dc   :  { %v187_v58 = vpop.f32.mrb[2].mxu1 }
 0x2dd   :  { %v188_v59 = vadd.f32 %v187_v58, %v72_v55  ;;  %v980_v60 = vpop.f32.mrb[3].mxu1  ;;  %v191_v61 = vsel %vm143_vm2, %v185_v56, -inf }
 0x2de   :  { %192 = vmax.xlane.f32.xlu1 %v191_v61 }
 0x2df   :  { %v194_v62 = vsel %vm143_vm2, %v188_v59, -inf }
 0x2e0   :  { %195 = vmax.xlane.f32.xlu0 %v194_v62 }
 0x2e2   :  { %v308_v63 = vpop.f32.mrb[4].mxu1 }
 0x2e3   :  { %v309_v0 = vadd.f32 %v308_v63, %v71_v53  ;;  %v991_v1 = vpop.f32.mrb[5].mxu1 }
 0x2e4   :  { %v311_v2 = vpop.f32.mrb[6].mxu1 }
 0x2e5   :  { %v312_v3 = vadd.f32 %v311_v2, %v72_v55  ;;  %v992_v4 = vpop.f32.mrb[7].mxu1  ;;  %v315_v5 = vsel %vm143_vm2, %v309_v0, -inf  ;;  %v915_v2 = vld [vmem:[%s1350_s4 + $0x3] ss:$0 sm:$0xff] }
 0x2e6   :  { %316 = vmax.xlane.f32.xlu0 %v315_v5 }
 0x2e7   :  { %v318_v6 = vsel %vm143_vm2, %v312_v3, -inf }
 0x2ea   :  { %319 = vmax.xlane.f32.xlu0 %v318_v6 }
 0x36b   :  { %v193_v7 = vpop.xlane.xlu1 %192 }
 0x36c   :  { %v197_v9 = vsub.f32 %v185_v56, %v193_v7 }
 0x36d   :  { %v196_v11 = vpop.xlane.xlu0 %195 }
 0x36e   :  { %v199_v12 = vmul.f32 1.442695, %v197_v9  ;;  %v198_v13 = vsub.f32 %v188_v59, %v196_v11 }
 0x370   :  { %1074 = vpow2.f32 %v199_v12  ;;  %v201_v14 = vmul.f32 1.442695, %v198_v13 }
 0x372   :  { %1076 = vpow2.f32 %v201_v14 }
 0x373   :  { %v317_v15 = vpop.xlane.xlu0 %316 }
 0x374   :  { %v321_v16 = vsub.f32 %v309_v0, %v317_v15 }
 0x376   :  { %v323_v17 = vmul.f32 1.442695, %v321_v16 }
 0x377   :  { %v320_v18 = vpop.xlane.xlu0 %319 }
 0x378   :  { %1078 = vpow2.f32 %v323_v17  ;;  %v322_v19 = vsub.f32 %v312_v3, %v320_v18 }
 0x37a   :  { %v1075_v20 = vpop.eup %1074  ;;  %v325_v21 = vmul.f32 1.442695, %v322_v19 }
 0x37b   :  { %v203_v22 = vsel %vm143_vm2, %v1075_v20, 0.0 }
 0x37c   :  { %v1077_v23 = vpop.eup %1076  ;;  %1080 = vpow2.f32 %v325_v21  ;;  %204 = vadd.xlane.f32.xlu1 %v203_v22 }
 0x37d   :  { %v206_v24 = vsel %vm143_vm2, %v1077_v23, 0.0 }
 0x37e   :  { %207 = vadd.xlane.f32.xlu0 %v206_v24 }
 0x382   :  { %v1079_v25 = vpop.eup %1078 }
 0x383   :  { %v327_v26 = vsel %vm143_vm2, %v1079_v25, 0.0 }
 0x384   :  { %328 = vadd.xlane.f32.xlu1 %v327_v26 }
 0x386   :  { %v1081_v27 = vpop.eup %1080 }
 0x387   :  { %v330_v28 = vsel %vm143_vm2, %v1081_v27, 0.0 }
 0x388   :  { %331 = vadd.xlane.f32.xlu0 %v330_v28 }
 0x395   :  { %214 = vrot.lane.b32.xlu1 %v1189_v47, %s1111_s1 }
 0x399   :  { %386 = vrot.lane.b32.xlu1 %v1163_v10, %s1113_s14 }
 0x39d   :  { %438 = vrot.lane.b32.xlu1 %v1057_v29, %s1113_s14 }
 0x39e   :  { %338 = vrot.lane.b32.xlu0 %v1189_v47, %s1112_s13 }
 0x409   :  { %v205_v30 = vpop.xlane.xlu1 %204 }
 0x40a   :  { %1082 = vrcp.f32 %v205_v30 }
 0x40b   :  { %v208_v31 = vpop.xlane.xlu0 %207 }
 0x40c   :  { %1084 = vrcp.f32 %v208_v31 }
 0x411   :  { %v329_v32 = vpop.xlane.xlu1 %328 }
 0x412   :  { %1086 = vrcp.f32 %v329_v32 }
 0x414   :  { %v1083_v33 = vpop.eup %1082 }
 0x415   :  { %v215_v34 = vpop.permute.xlu1 %214  ;;  %v332_v35 = vpop.xlane.xlu0 %331  ;;  %v211_v39 = vmul.f32 %v1083_v33, %v1075_v20 }
 0x416   :  { %v1085_v36 = vpop.eup %1084  ;;  %1088 = vrcp.f32 %v332_v35  ;;  %982 = vmatpush3.bf16.msra.mxu0 %v215_v34 }
 0x417   :  { %v212_v10 = vmul.f32 %v1085_v36, %v1077_v23  ;;  %993 = vmatprep.subr.bf16.mxu0 %v1106_v8 }
 0x419   :  { %v339_v40 = vpop.permute.xlu0 %338  ;;  %v213_v41 = vpack.c.bf16 %v212_v10, %v211_v39  ;;  %v387_v42 = vpop.permute.xlu1 %386  ;;  %v916_v39 = vld [vmem:[%s1350_s4 + $0x4] ss:$0 sm:$0xff] }
 0x41a   :  { %1000 = vmatpush3.bf16.msra.mxu1 %v387_v42 }
 0x41b   :  { %984 = vmatmul.mubr.msk.bf16.vlgmr.msra.gmra.mrb[4].mxu0 %vm143_vm2, %v213_v41  ;;  %1011 = vmatprep.subr.bf16.mxu1 %v1106_v8 }
 0x41c   :  { %994 = vmatpush3.bf16.msra.mxu0 %v339_v40  ;;  %995 = vmatprep.mubr.msk.bf16.mxu0 %vm1107_vm1, %v1106_v8  ;;  %v1087_v43 = vpop.eup %1086 }
 0x41d   :  { %1005 = vmatprep.subr.bf16.mxu0 %v1106_v8  ;;  %v335_v45 = vmul.f32 %v1087_v43, %v1079_v25  ;;  %v439_v48 = vpop.permute.xlu1 %438  ;;  %v917_v43 = vld [vmem:[%s1350_s4 + $0x5] ss:$0 sm:$0xff] }
 0x420   :  { %v1089_v44 = vpop.eup %1088 }
 0x421   :  { %v336_v46 = vmul.f32 %v1089_v44, %v1081_v27 }
 0x423   :  { %v337_v47 = vpack.c.bf16 %v336_v46, %v335_v45 }
 0x425   :  { %996 = vmatmul.mubr.msk.bf16.vlgmr.msra.gmra.mrb[8].mxu0 %vm143_vm2, %v337_v47 }
 0x426   :  { %1007 = vmatprep.mubr.msk.bf16.mxu0 %vm1107_vm1, %v1106_v8  ;;  %1006 = vmatpush3.bf16.msra.mxu0 %v439_v48  ;;  %v1060_v48 = vld [vmem:[%s1352_s3] sm:$0xff]  }
 0x427   :  { %1019 = vmatprep.subr.bf16.mxu0 %v1106_v8 }
 0x4ee   :  { %v254_v49 = vpop.f32.mrb[4].mxu0 }
 0x4ef   :  { %v985_v50 = vpop.f32.mrb[5].mxu0 }
 0x4f0   :  { %v257_v51 = vpop.f32.mrb[6].mxu0  ;;  %v1062_v50 = vld [vmem:[%s1352_s3 + $0x10] sm:$0xff]  }
 0x4f1   :  { %v261_v52 = vpack.c.bf16 %v257_v51, %v254_v49  ;;  %v986_v53 = vpop.f32.mrb[7].mxu0  ;;  %v1061_v49 = vld [vmem:[%s1352_s3 + $0x8] sm:$0xff]   ;;  %v1063_v51 = vld [vmem:[%s1352_s3 + $0x18] sm:$0xff]  }
 0x4f3   :  { %1008 = vmatmul.mubr.msk.bf16.vlgmr.msra.gmra.mrb[12].mxu0 %vm143_vm2, %v261_v52  ;;  %v918_v52 = vld [vmem:[%s1350_s4 + $0x6] ss:$0 sm:$0xff] }
 0x4f4   :  { %1027 = vmatprep.mubr.msk.bf16.mxu0 %vm1107_vm1, %v1106_v8  ;;  %1020 = vmatpush3.bf16.msra.mxu0 %v1060_v48 }
 0x4f5   :  { %1021 = vmatprep.subr.bf16.mxu0 %v1106_v8 }
 0x4f8   :  { %v378_v54 = vpop.f32.mrb[8].mxu0  ;;  %1022 = vmatpush3.bf16.msra.mxu0 %v1061_v49 }
 0x4f9   :  { %v997_v55 = vpop.f32.mrb[9].mxu0  ;;  %1023 = vmatprep.subr.bf16.mxu0 %v1106_v8 }
 0x4fa   :  { %v381_v56 = vpop.f32.mrb[10].mxu0 }
 0x4fb   :  { %v385_v57 = vpack.c.bf16 %v381_v56, %v378_v54  ;;  %v998_v58 = vpop.f32.mrb[11].mxu0 }
 0x4fc   :  { %1024 = vmatpush3.bf16.msra.mxu0 %v1062_v50 }
 0x4fd   :  { %1002 = vmatmul.mubr.msk.bf16.vlgmr.msra.gmra.mrb[8].mxu1 %vm143_vm2, %v385_v57  ;;  %1025 = vmatprep.subr.bf16.mxu0 %v1106_v8 }
 0x4fe   :  { %1015 = vmatprep.mubr.msk.bf16.mxu1 %vm1107_vm1, %v1106_v8 }
 0x500   :  { %1026 = vmatpush3.bf16.msra.mxu0 %v1063_v51 }
 0x5c6   :  { %v478_v59 = vpop.f32.mrb[12].mxu0 }
 0x5c7   :  { %v1009_v60 = vpop.f32.mrb[13].mxu0 }
 0x5c8   :  { %v481_v61 = vpop.f32.mrb[14].mxu0 }
 0x5c9   :  { %v1010_v62 = vpop.f32.mrb[15].mxu0 }
 0x5d0   :  { %v426_v63 = vpop.f32.mrb[8].mxu1 }
 0x5d1   :  { %v479_v0 = vadd.f32 %v478_v59, %v426_v63  ;;  %v1003_v1 = vpop.f32.mrb[9].mxu1 }
 0x5d2   :  { %v429_v3 = vpop.f32.mrb[10].mxu1 }
 0x5d3   :  { %v485_v4 = vadd.f32 %v479_v0, %v1177_v37  ;;  %v482_v5 = vadd.f32 %v481_v61, %v429_v3  ;;  %v1004_v6 = vpop.f32.mrb[11].mxu1  ;;  %v1256_v37 = vld [vmem:[%s1349_s2 + $0x4] ss:$12 sps:$4 sm:$0xff]  }
 0x5d4   :  { %1012 = vmatpush3.bf16.msra.mxu1 %v1256_v37 }
 0x5d5   :  { %v492_v7 = vadd.f32 %v915_v2, %v485_v4  ;;  %v486_v9 = vadd.f32 %v482_v5, %v1179_v38  ;;  %v1262_v38 = vld [vmem:[%s1349_s2 + $0x1c] ss:$12 sps:$4 sm:$0xff]   ;;  %1013 = vmatprep.subr.bf16.mxu1 %v1106_v8 }
 0x5d7   :  { %v493_v11 = vadd.f32 %v915_v2, %v486_v9  ;;  %v494_v12 = vsel %vm23_vm0, %v492_v7, 0.0  ;;  %v502_v14 = vmul.f32 %v492_v7, %v492_v7 }
 0x5d8   :  { %495 = vadd.xlane.f32.xlu1 %v494_v12  ;;  %1014 = vmatpush3.bf16.msra.mxu1 %v1262_v38 }
 0x5d9   :  { %v497_v13 = vsel %vm23_vm0, %v493_v11, 0.0  ;;  %v504_v15 = vsel %vm23_vm0, %v502_v14, 0.0  ;;  %v503_v16 = vmul.f32 %v493_v11, %v493_v11  ;;  %1031 = vmatprep.subr.bf16.mxu1 %v1106_v8 }
 0x5da   :  { %498 = vadd.xlane.f32.xlu0 %v497_v13 }
 0x5db   :  { %v507_v17 = vsel %vm23_vm0, %v503_v16, 0.0  ;;  %v922_v16 = vld [vmem:[%s1350_s4 + $0x7] ss:$0 sm:$0xff] }
 0x5de   :  { %505 = vadd.xlane.f32.xlu0 %v504_v15 }
 0x5e2   :  { %508 = vadd.xlane.f32.xlu0 %v507_v17 }
 0x665   :  { %v496_v18 = vpop.xlane.xlu1 %495 }
 0x666   :  { %v500_v20 = vmul.f32 0.03125, %v496_v18 }
 0x667   :  { %v499_v19 = vpop.xlane.xlu0 %498 }
 0x668   :  { %v512_v22 = vmul.f32 %v500_v20, %v500_v20  ;;  %v501_v23 = vmul.f32 0.03125, %v499_v19  ;;  %v518_v34 = vsub.f32 %v492_v7, %v500_v20 }
 0x66a   :  { %v513_v27 = vmul.f32 %v501_v23, %v501_v23  ;;  %v519_v10 = vsub.f32 %v493_v11, %v501_v23 }
 0x66b   :  { %v506_v21 = vpop.xlane.xlu0 %505 }
 0x66c   :  { %v510_v24 = vmul.f32 0.03125, %v506_v21 }
 0x66e   :  { %v514_v25 = vsub.f32 %v510_v24, %v512_v22 }
 0x66f   :  { %v509_v26 = vpop.xlane.xlu0 %508 }
 0x670   :  { %v516_v28 = vmax.f32 %v514_v25, 0.0  ;;  %v511_v29 = vmul.f32 0.03125, %v509_v26 }
 0x672   :  { %v520_v30 = vadd.f32 1e-12, %v516_v28  ;;  %v515_v31 = vsub.f32 %v511_v29, %v513_v27 }
 0x674   :  { %1090 = vrsqrt.f32 %v520_v30  ;;  %v517_v32 = vmax.f32 %v515_v31, 0.0  ;;  %v1064_v31 = vld [vmem:[%s1349_s2 + $0x4] ss:$12 sps:$4 sm:$0xff]  }
 0x676   :  { %v521_v33 = vadd.f32 1e-12, %v517_v32  ;;  %v1069_v32 = vld [vmem:[%s1349_s2 + $0x20] ss:$12 sps:$4 sm:$0xff]  }
 0x678   :  { %1092 = vrsqrt.f32 %v521_v33  ;;  %v1066_v33 = vld [vmem:[%s1349_s2 + $0x8] ss:$12 sps:$4 sm:$0xff]  }
 0x67e   :  { %v1091_v35 = vpop.eup %1090 }
 0x67f   :  { %v524_v36 = vmul.f32 %v1091_v35, %v518_v34 }
 0x681   :  { %v531_v42 = vmul.f32 %v916_v39, %v524_v36 }
 0x682   :  { %v1093_v40 = vpop.eup %1092 }
 0x683   :  { %v525_v41 = vmul.f32 %v1093_v40, %v519_v10  ;;  %v538_v45 = vadd.f32 %v917_v43, %v531_v42 }
 0x685   :  { %v532_v44 = vmul.f32 %v916_v39, %v525_v41 }
 0x687   :  { %v539_v46 = vadd.f32 %v917_v43, %v532_v44 }
 0x689   :  { %v544_v47 = vpack.c.bf16 %v539_v46, %v538_v45 }
 0x68b   :  { %1016 = vmatmul.mubr.msk.bf16.vlgmr.msra.gmra.mrb[12].mxu1 %vm23_vm0, %v544_v47 }
 0x68c   :  { %1035 = vmatprep.mubr.msk.bf16.mxu1 %vm1107_vm1, %v1106_v8 }
 0x75e   :  { %v599_v53 = vpop.f32.mrb[12].mxu1 }
 0x75f   :  { %v600_v54 = vadd.f32 %v918_v52, %v599_v53  ;;  %v1017_v55 = vpop.f32.mrb[13].mxu1 }
 0x760   :  { %v602_v56 = vpop.f32.mrb[14].mxu1 }
 0x761   :  { %v606_v57 = vmul.f32 %v600_v54, %v600_v54  ;;  %v603_v58 = vadd.f32 %v918_v52, %v602_v56  ;;  %v1018_v59 = vpop.f32.mrb[15].mxu1 }
 0x763   :  { %v608_v60 = vmul.f32 %v606_v57, %v600_v54  ;;  %v607_v61 = vmul.f32 %v603_v58, %v603_v58 }
 0x765   :  { %v610_v62 = vmul.f32 0.044715, %v608_v60  ;;  %v609_v63 = vmul.f32 %v607_v61, %v603_v58  ;;  %v929_v60 = vld [vmem:[%s1350_s4 + $0x9] ss:$0 sm:$0xff] }
 0x767   :  { %v612_v0 = vadd.f32 %v610_v62, %v600_v54  ;;  %v611_v1 = vmul.f32 0.044715, %v609_v63 }
 0x769   :  { %v614_v2 = vmul.f32 0.7978846, %v612_v0  ;;  %v613_v3 = vadd.f32 %v611_v1, %v603_v58 }
 0x76b   :  { %1094 = vtanh.f32 %v614_v2  ;;  %v615_v4 = vmul.f32 0.7978846, %v613_v3 }
 0x76d   :  { %1096 = vtanh.f32 %v615_v4 }
 0x775   :  { %v1095_v5 = vpop.eup %1094 }
 0x776   :  { %v618_v6 = vadd.f32 1.0, %v1095_v5 }
 0x777   :  { %v1097_v7 = vpop.eup %1096 }
 0x778   :  { %v620_v9 = vmul.f32 0.5, %v618_v6  ;;  %v619_v11 = vadd.f32 1.0, %v1097_v7  ;;  %v930_v7 = vld [vmem:[%s1350_s4 + $0xa] ss:$0 sm:$0xff] }
 0x77a   :  { %v621_v12 = vmul.f32 0.5, %v619_v11  ;;  %v622_v13 = vmul.f32 %v620_v9, %v600_v54  ;;  %v928_v54 = vld [vmem:[%s1350_s4 + $0x8] ss:$0 sm:$0xff] }
 0x77c   :  { %v623_v14 = vmul.f32 %v621_v12, %v603_v58 }
 0x77e   :  { %v624_v15 = vpack.c.bf16 %v623_v14, %v622_v13 }
 0x780   :  { %1028 = vmatmul.mubr.msk.bf16.vlgmr.msra.gmra.mrb[16].mxu0 %vm662_vm3, %v624_v15 }
 0x853   :  { %v700_v17 = vpop.f32.mrb[16].mxu0 }
 0x854   :  { %v701_v18 = vadd.f32 %v922_v16, %v700_v17  ;;  %v1029_v19 = vpop.f32.mrb[17].mxu0 }
 0x855   :  { %v703_v20 = vpop.f32.mrb[18].mxu0 }
 0x856   :  { %v707_v21 = vadd.f32 %v701_v18, %v538_v45  ;;  %v704_v22 = vadd.f32 %v922_v16, %v703_v20  ;;  %v1030_v23 = vpop.f32.mrb[19].mxu0 }
 0x858   :  { %v708_v24 = vadd.f32 %v704_v22, %v539_v46  ;;  %v709_v25 = vsel %vm23_vm0, %v707_v21, 0.0  ;;  %v717_v26 = vmul.f32 %v707_v21, %v707_v21 }
 0x859   :  { %710 = vadd.xlane.f32.xlu1 %v709_v25 }
 0x85a   :  { %v712_v27 = vsel %vm23_vm0, %v708_v24, 0.0  ;;  %v718_v28 = vmul.f32 %v708_v24, %v708_v24  ;;  %v719_v29 = vsel %vm23_vm0, %v717_v26, 0.0 }
 0x85b   :  { %713 = vadd.xlane.f32.xlu0 %v712_v27 }
 0x85c   :  { %v722_v30 = vsel %vm23_vm0, %v718_v28, 0.0 }
 0x85d   :  { %720 = vadd.xlane.f32.xlu1 %v719_v29 }
 0x85f   :  { %723 = vadd.xlane.f32.xlu0 %v722_v30 }
 0x86e   :  { %761 = vrot.lane.b32.xlu1 %v1256_v37, %s1111_s1  ;;  %v1067_v37 = vld [vmem:[%s1349_s2 + $0x1c] ss:$12 sps:$4 sm:$0xff]  }
 0x872   :  { %839 = vrot.lane.b32.xlu1 %v1064_v31, %s1113_s14 }
 0x875   :  { %763 = vrot.lane.b32.xlu0 %v1262_v38, %s1111_s1 }
 0x876   :  { %841 = vrot.lane.b32.xlu1 %v1066_v33, %s1113_s14 }
 0x879   :  { %845 = vrot.lane.b32.xlu0 %v1069_v32, %s1113_s14 }
 0x87a   :  { %843 = vrot.lane.b32.xlu1 %v1067_v37, %s1113_s14 }
 0x8e6   :  { %v711_v38 = vpop.xlane.xlu1 %710 }
 0x8e7   :  { %v715_v34 = vmul.f32 0.03125, %v711_v38 }
 0x8e8   :  { %v714_v35 = vpop.xlane.xlu0 %713 }
 0x8e9   :  { %v716_v36 = vmul.f32 0.03125, %v714_v35  ;;  %v727_v10 = vmul.f32 %v715_v34, %v715_v34  ;;  %v733_v52 = vsub.f32 %v707_v21, %v715_v34 }
 0x8ea   :  { %v721_v39 = vpop.xlane.xlu1 %720 }
 0x8eb   :  { %v725_v40 = vmul.f32 0.03125, %v721_v39  ;;  %v728_v42 = vmul.f32 %v716_v36, %v716_v36  ;;  %v734_v55 = vsub.f32 %v708_v24, %v716_v36 }
 0x8ec   :  { %v724_v41 = vpop.xlane.xlu0 %723 }
 0x8ed   :  { %v729_v43 = vsub.f32 %v725_v40, %v727_v10  ;;  %v726_v44 = vmul.f32 0.03125, %v724_v41 }
 0x8ee   :  { %v762_v45 = vpop.permute.xlu1 %761 }
 0x8ef   :  { %v731_v46 = vmax.f32 %v729_v43, 0.0  ;;  %v730_v47 = vsub.f32 %v726_v44, %v728_v42  ;;  %1032 = vmatpush3.bf16.msra.mxu1 %v762_v45 }
 0x8f0   :  { %1033 = vmatprep.subr.bf16.mxu1 %v1106_v8  ;;  %v764_v48 = vpop.permute.xlu0 %763 }
 0x8f1   :  { %v735_v49 = vadd.f32 1e-12, %v731_v46  ;;  %v732_v50 = vmax.f32 %v730_v47, 0.0 }
 0x8f2   :  { %v840_v1 = vpop.permute.xlu1 %839 }
 0x8f3   :  { %1098 = vrsqrt.f32 %v735_v49  ;;  %v736_v51 = vadd.f32 1e-12, %v732_v50  ;;  %1034 = vmatpush3.bf16.msra.mxu1 %v764_v48 }
 0x8f4   :  { %1039 = vmatprep.subr.bf16.mxu1 %v1106_v8  ;;  %v846_v4 = vpop.permute.xlu0 %845 }
 0x8f5   :  { %1100 = vrsqrt.f32 %v736_v51 }
 0x8f6   :  { %v842_v2 = vpop.permute.xlu1 %841 }
 0x8f7   :  { %v848_v3 = vsel %vm23_vm0, %v840_v1, %v842_v2 }
 0x8fa   :  { %v844_v5 = vpop.permute.xlu1 %843 }
 0x8fb   :  { %v849_v6 = vsel %vm23_vm0, %v844_v5, %v846_v4 }
 0x8fd   :  { %v1099_v53 = vpop.eup %1098 }
 0x8fe   :  { %v739_v56 = vmul.f32 %v1099_v53, %v733_v52 }
 0x8ff   :  { %v1101_v57 = vpop.eup %1100 }
 0x900   :  { %v740_v58 = vmul.f32 %v1101_v57, %v734_v55  ;;  %v746_v59 = vmul.f32 %v928_v54, %v739_v56 }
 0x902   :  { %v747_v61 = vmul.f32 %v928_v54, %v740_v58  ;;  %v753_v62 = vadd.f32 %v929_v60, %v746_v59 }
 0x904   :  { %v754_v63 = vadd.f32 %v929_v60, %v747_v61 }
 0x906   :  { %v755_v0 = vpack.c.bf16 %v754_v63, %v753_v62 }
 0x908   :  { %1036 = vmatmul.mubr.msk.bf16.vlgmr.msra.gmra.mrb[16].mxu1 %vm23_vm0, %v755_v0 }
 0x909   :  { %1043 = vmatprep.mubr.msk.bf16.mxu1 %vm1107_vm1, %v1106_v8  ;;  %1040 = vmatpush3.bf16.msra.mxu1 %v848_v3 }
 0x90a   :  { %1041 = vmatprep.subr.bf16.mxu1 %v1106_v8  ;;  %v932_v8 = vld [vmem:[%s1350_s4 + $0xb] ss:$0 sm:$0xff] }
 0x90d   :  { %1042 = vmatpush3.bf16.msra.mxu1 %v849_v6 }
 0x9db   :  { %v804_v9 = vpop.f32.mrb[16].mxu1 }
 0x9dc   :  { %v805_v11 = vadd.f32 %v930_v7, %v804_v9  ;;  %v1037_v12 = vpop.f32.mrb[17].mxu1 }
 0x9dd   :  { %v807_v13 = vpop.f32.mrb[18].mxu1 }
 0x9de   :  { %v808_v14 = vadd.f32 %v930_v7, %v807_v13  ;;  %v1038_v15 = vpop.f32.mrb[19].mxu1  ;;  %1102 = vtanh.f32 %v805_v11 }
 0x9e0   :  { %1104 = vtanh.f32 %v808_v14 }
 0x9e8   :  { %v1103_v16 = vpop.eup %1102 }
 0x9ea   :  { %v1105_v17 = vpop.eup %1104 }
 0x9eb   :  { %v817_v18 = vpack.c.bf16 %v1105_v17, %v1103_v16 }
 0x9ed   :  { %1044 = vmatmul.mubr.msk.bf16.vlgmr.msra.gmra.mrb[20].mxu1 %vm23_vm0, %v817_v18 }
 0xac0   :  { %v889_v19 = vpop.f32.mrb[20].mxu1 }
 0xac1   :  { %v890_v20 = vadd.f32 %v932_v8, %v889_v19  ;;  %v1045_v21 = vpop.f32.mrb[21].mxu1 }
 0xac2   :  { %v892_v22 = vpop.f32.mrb[22].mxu1 }
 0xac3   :  { %896 = vst [vmem:[%s1353_s5] sm:$0xff] %v890_v20  ;;  %v893_v23 = vadd.f32 %v932_v8, %v892_v22  ;;  %v1046_v24 = vpop.f32.mrb[23].mxu1 }
 0xac5   :  { %897 = vst [vmem:[%s1353_s5 + $0x8] sm:$0xff] %v893_v23 }

</bundles_post_ra>
